<compile_context>
chip_gen: v5e
topology: v5e:2x2
jax: 0.10.0
libtpu: 0.0.40
codegen_flags: <defaults>
</compile_context>

<pallas_src>
import functools

import jax
import jax.numpy as jnp
from jax.experimental import pallas as pl
from jax.experimental.pallas import tpu as pltpu

_PDIST_EPS = 1e-6  # PyTorch PairwiseDistance default eps
_MIB = 1024 * 1024


def _round_up(x, m):
    return ((x + m - 1) // m) * m


def _tpu_generation():
    """Returns (per-core VMEM bytes, TensorCores per chip) with safe fallbacks."""
    vmem_bytes = 128 * _MIB
    num_tc = 1
    try:
        info = pltpu.get_tpu_info()
        v = getattr(info, "vmem_capacity_bytes", None)
        if v:
            vmem_bytes = int(v)
        for attr in ("num_tensorcores", "num_cores", "tensorcore_count",
                     "cores_per_chip"):
            c = getattr(info, attr, None)
            if c:
                num_tc = int(c)
                break
    except Exception:
        pass
    try:
        kind = jax.devices()[0].device_kind.lower()
    except Exception:
        kind = ""
    if "v7" in kind:                       # v7x: 2 TCs, 64 MiB VMEM per TC
        num_tc = max(num_tc, 2)
        vmem_bytes = min(vmem_bytes, 64 * _MIB)
    if vmem_bytes <= 64 * _MIB:            # small per-core VMEM => v7x-class
        num_tc = max(num_tc, 2)
    return vmem_bytes, num_tc


def _pick_tile_rows(batch, dim, itemsize, budget_bytes):
    """Largest sublane-friendly batch tile that fits the VMEM budget."""
    b_pad = _round_up(max(batch, 1), 8)
    # 6 input streams x 2 (double-buffer) in their HBM dtype, plus ~6 live
    # (TB, D) f32 temporaries (casts / diffs) kept by the compiler in VMEM.
    per_row = 6 * 2 * dim * itemsize + 6 * dim * 4
    tb = budget_bytes // max(per_row, 1)
    tb = max(16, (tb // 16) * 16)          # sublane-friendly for f32 and bf16
    return min(tb, b_pad)


def _quad_triplet_kernel(a_ref, p_ref, n_ref, am_ref, pm_ref, nm_ref, out_ref, *,
                         alphas, batch, dim, tile_rows, tiles_per_split):
    i = pl.program_id(1)

    @pl.when(i == 0)
    def _init():
        out_ref[...] = jnp.zeros_like(out_ref)

    a = a_ref[...].astype(jnp.float32)
    p = p_ref[...].astype(jnp.float32)
    n = n_ref[...].astype(jnp.float32)
    am = am_ref[...].astype(jnp.float32)
    pm = pm_ref[...].astype(jnp.float32)
    nm = nm_ref[...].astype(jnp.float32)

    two_eps = jnp.float32(2.0 * _PDIST_EPS)
    eps2d = jnp.float32(dim * _PDIST_EPS * _PDIST_EPS)
    zero = jnp.float32(0.0)

    def dist(x, y):
        # ||x - y + eps||_2 with eps folded out of the per-element hot loop:
        #   sum((d+eps)^2) = sum(d^2) + 2*eps*sum(d) + D*eps^2
        # clamped at 0 before sqrt (fp cancellation can go slightly negative).
        d = x - y
        s2 = jnp.sum(d * d, axis=-1, keepdims=True)   # (TB, 1)
        s1 = jnp.sum(d, axis=-1, keepdims=True)       # (TB, 1), extra XLU reduce
        s = s2 + two_eps * s1 + eps2d
        return jnp.sqrt(jnp.maximum(s, zero))

    a1, a2, a3, a4 = (jnp.float32(v) for v in alphas)

    # All four hinges combined into one per-row vector.
    hinge = (jnp.maximum(a1 + dist(a, p) - dist(a, n), zero)
             + jnp.maximum(a2 + dist(a, pm) - dist(a, nm), zero)
             + jnp.maximum(a3 + dist(am, p) - dist(am, n), zero)
             + jnp.maximum(a4 + dist(am, pm) - dist(am, nm), zero))  # (TB, 1)

    # Mask rows outside the true batch (remainder / clamped overhang tiles).
    # Keep the mask AFTER the nonlinearity so garbage-row Inf/NaN never leaks.
    t = pl.program_id(0) * tiles_per_split + i          # unclamped global tile
    row = t * tile_rows + jax.lax.broadcasted_iota(jnp.int32, hinge.shape, 0)
    hinge = jnp.where(row < batch, hinge, zero)

    # Per-step scalar reduce (XLU) accumulated into the tiny output block.
    out_ref[...] += jnp.sum(hinge)

    @pl.when(i == pl.num_programs(1) - 1)
    def _finalize():
        out_ref[...] = out_ref[...] * jnp.float32(1.0 / batch)


def quad_triplet_loss(anchor, positive, negative,
                      anchor_masked, positive_masked, negative_masked,
                      alpha1=0.2, alpha2=0.2, alpha3=0.2, alpha4=0.2):
    B, D = anchor.shape
    itemsize = jnp.dtype(anchor.dtype).itemsize

    vmem_bytes, num_tc = _tpu_generation()
    if vmem_bytes <= 64 * _MIB:            # v7x-class: 64 MiB VMEM per TC
        budget, vmem_limit = 40 * _MIB, 48 * _MIB
    else:                                  # v5e / v6e: 128 MiB physical VMEM
        budget, vmem_limit = 44 * _MIB, 64 * _MIB

    tb = _pick_tile_rows(B, D, itemsize, budget)
    num_tiles = pl.cdiv(B, tb)
    # 2-way megacore split only where there are actually 2 TensorCores.
    ns = 2 if (num_tc >= 2 and num_tiles >= 2) else 1
    tiles_per_split = pl.cdiv(num_tiles, ns)

    def in_index(c, i):
        t = c * tiles_per_split + i
        t = jnp.minimum(t, num_tiles - 1)   # clamp the (masked) overhang tile
        return (t, 0)

    in_spec = pl.BlockSpec((tb, D), in_index)
    out_spec = pl.BlockSpec((1, 8, 128), lambda c, i: (c, 0, 0))

    kernel = functools.partial(
        _quad_triplet_kernel,
        alphas=(alpha1, alpha2, alpha3, alpha4),
        batch=B, dim=D, tile_rows=tb, tiles_per_split=tiles_per_split)

    cost = pl.CostEstimate(
        flops=int(32 * B * D),
        transcendentals=int(8 * B),
        bytes_accessed=int(6 * B * D * itemsize + 4 * ns * 8 * 128))

    out = pl.pallas_call(
        kernel,
        out_shape=jax.ShapeDtypeStruct((ns, 8, 128), jnp.float32),
        grid_spec=pltpu.PrefetchScalarGridSpec(
            num_scalar_prefetch=0,
            grid=(ns, tiles_per_split),
            in_specs=[in_spec] * 6,
            out_specs=out_spec),
        compiler_params=pltpu.CompilerParams(
            dimension_semantics=("parallel", "arbitrary"),
            vmem_limit_bytes=vmem_limit),
        cost_estimate=cost,
    )(anchor, positive, negative, anchor_masked, positive_masked, negative_masked)

    # One partial per split (each already divided by the true B); combine.
    return jnp.sum(out[:, 0, 0])


def _reference(anchor, positive, negative, am, pm, nm, a1, a2, a3, a4):
    def pdist(x, y):
        d = x - y + _PDIST_EPS
        return jnp.sqrt(jnp.sum(d * d, axis=-1))

    def tl(anc, pos, neg, m):
        return jnp.mean(jnp.maximum(m + pdist(anc, pos) - pdist(anc, neg), 0.0))

    return (tl(anchor, positive, negative, a1)
            + tl(anchor, pm, nm, a2)
            + tl(am, positive, negative, a3)
            + tl(am, pm, nm, a4))


if __name__ == "__main__":
    B, D = 8, 32
    key = jax.random.PRNGKey(0)
    keys = jax.random.split(key, 6)
    anchor = jax.random.normal(keys[0], (B, D), dtype=jnp.float32)
    positive = jax.random.normal(keys[1], (B, D), dtype=jnp.float32)
    negative = jax.random.normal(keys[2], (B, D), dtype=jnp.float32)
    anchor_m = jax.random.normal(keys[3], (B, D), dtype=jnp.float32)
    positive_m = jax.random.normal(keys[4], (B, D), dtype=jnp.float32)
    negative_m = jax.random.normal(keys[5], (B, D), dtype=jnp.float32)

    a1, a2, a3, a4 = 0.2, 0.3, 0.4, 0.5

    loss = quad_triplet_loss(anchor, positive, negative,
                             anchor_m, positive_m, negative_m,
                             a1, a2, a3, a4)
    loss = jax.block_until_ready(loss)

    ref = _reference(anchor, positive, negative,
                     anchor_m, positive_m, negative_m, a1, a2, a3, a4)
    assert jnp.allclose(loss, ref, rtol=1e-4, atol=1e-4), (loss, ref)
    print("KERNEL_OK")
</pallas_src>

<mosaic_0001>
module attributes {stable_mosaic.version = 11 : i64} {
  func.func @_quad_triplet_kernel(%arg0: i32, %arg1: i32, %arg2: memref<8x32xf32, #tpu.memory_space<vmem>>, %arg3: memref<8x32xf32, #tpu.memory_space<vmem>>, %arg4: memref<8x32xf32, #tpu.memory_space<vmem>>, %arg5: memref<8x32xf32, #tpu.memory_space<vmem>>, %arg6: memref<8x32xf32, #tpu.memory_space<vmem>>, %arg7: memref<8x32xf32, #tpu.memory_space<vmem>>, %arg8: memref<1x8x128xf32, #tpu.memory_space<vmem>>) attributes {dimension_semantics = [#tpu.dimension_semantics<parallel>, #tpu.dimension_semantics<arbitrary>], iteration_bounds = array<i64: 1, 1>, scalar_prefetch = 0 : i64, scratch_operands = 0 : i64, tpu.core_type = #tpu.core_type<tc>, window_params = [{transform_indices = @transform_0, window_bounds = array<i64: 8, 32>}, {transform_indices = @transform_1, window_bounds = array<i64: 8, 32>}, {transform_indices = @transform_2, window_bounds = array<i64: 8, 32>}, {transform_indices = @transform_3, window_bounds = array<i64: 8, 32>}, {transform_indices = @transform_4, window_bounds = array<i64: 8, 32>}, {transform_indices = @transform_5, window_bounds = array<i64: 8, 32>}, {transform_indices = @transform_6, window_bounds = array<i64: 1, 8, 128>}]} {
    %c0_i32 = arith.constant 0 : i32
    %0 = arith.cmpi eq, %arg1, %c0_i32 : i32
    %1 = arith.extui %0 : i1 to i32
    %c0_i32_0 = arith.constant 0 : i32
    %2 = arith.cmpi ne, %1, %c0_i32_0 : i32
    scf.if %2 {
      %cst_70 = arith.constant 0.000000e+00 : f32
      %165 = vector.broadcast %cst_70 : f32 to vector<1x8x128xf32>
      %c0_71 = arith.constant 0 : index
      %c0_72 = arith.constant 0 : index
      %c0_73 = arith.constant 0 : index
      %166 = vector.load %arg8[%c0_71, %c0_72, %c0_73] : memref<1x8x128xf32, #tpu.memory_space<vmem>>, vector<1x8x128xf32>
      tpu.vector_store %arg8[%c0_71, %c0_72, %c0_73], %165 {strides = array<i32>} : memref<1x8x128xf32, #tpu.memory_space<vmem>>, vector<1x8x128xf32>,
    } else {
    }
    %c0 = arith.constant 0 : index
    %c0_1 = arith.constant 0 : index
    %3 = vector.load %arg2[%c0, %c0_1] : memref<8x32xf32, #tpu.memory_space<vmem>>, vector<8x32xf32>
    %c0_2 = arith.constant 0 : index
    %c0_3 = arith.constant 0 : index
    %4 = vector.load %arg3[%c0_2, %c0_3] : memref<8x32xf32, #tpu.memory_space<vmem>>, vector<8x32xf32>
    %c0_4 = arith.constant 0 : index
    %c0_5 = arith.constant 0 : index
    %5 = vector.load %arg4[%c0_4, %c0_5] : memref<8x32xf32, #tpu.memory_space<vmem>>, vector<8x32xf32>
    %c0_6 = arith.constant 0 : index
    %c0_7 = arith.constant 0 : index
    %6 = vector.load %arg5[%c0_6, %c0_7] : memref<8x32xf32, #tpu.memory_space<vmem>>, vector<8x32xf32>
    %c0_8 = arith.constant 0 : index
    %c0_9 = arith.constant 0 : index
    %7 = vector.load %arg6[%c0_8, %c0_9] : memref<8x32xf32, #tpu.memory_space<vmem>>, vector<8x32xf32>
    %c0_10 = arith.constant 0 : index
    %c0_11 = arith.constant 0 : index
    %8 = vector.load %arg7[%c0_10, %c0_11] : memref<8x32xf32, #tpu.memory_space<vmem>>, vector<8x32xf32>
    %9 = arith.subf %3, %4 : vector<8x32xf32>
    %10 = arith.mulf %9, %9 : vector<8x32xf32>
    %cst = arith.constant dense<0.000000e+00> : vector<8xf32>
    %11 = vector.multi_reduction <add>, %10, %cst [1] : vector<8x32xf32> to vector<8xf32>
    %12 = vector.shape_cast %11 : vector<8xf32> to vector<8x1xf32>
    %cst_12 = arith.constant dense<0.000000e+00> : vector<8xf32>
    %13 = vector.multi_reduction <add>, %9, %cst_12 [1] : vector<8x32xf32> to vector<8xf32>
    %14 = vector.shape_cast %13 : vector<8xf32> to vector<8x1xf32>
    %cst_13 = arith.constant 2.000000e-06 : f32
    %15 = vector.broadcast %cst_13 : f32 to vector<8x1xf32>
    %16 = arith.mulf %15, %14 : vector<8x1xf32>
    %17 = arith.addf %12, %16 : vector<8x1xf32>
    %cst_14 = arith.constant 3.200000e-11 : f32
    %18 = vector.broadcast %cst_14 : f32 to vector<8x1xf32>
    %19 = arith.addf %17, %18 : vector<8x1xf32>
    %cst_15 = arith.constant 0.000000e+00 : f32
    %20 = vector.broadcast %cst_15 : f32 to vector<8x1xf32>
    %21 = arith.maximumf %19, %20 : vector<8x1xf32>
    %22 = math.sqrt %21 : vector<8x1xf32>
    %cst_16 = arith.constant 2.000000e-01 : f32
    %23 = vector.broadcast %cst_16 : f32 to vector<8x1xf32>
    %24 = arith.addf %23, %22 : vector<8x1xf32>
    %25 = arith.subf %3, %5 : vector<8x32xf32>
    %26 = arith.mulf %25, %25 : vector<8x32xf32>
    %cst_17 = arith.constant dense<0.000000e+00> : vector<8xf32>
    %27 = vector.multi_reduction <add>, %26, %cst_17 [1] : vector<8x32xf32> to vector<8xf32>
    %28 = vector.shape_cast %27 : vector<8xf32> to vector<8x1xf32>
    %cst_18 = arith.constant dense<0.000000e+00> : vector<8xf32>
    %29 = vector.multi_reduction <add>, %25, %cst_18 [1] : vector<8x32xf32> to vector<8xf32>
    %30 = vector.shape_cast %29 : vector<8xf32> to vector<8x1xf32>
    %cst_19 = arith.constant 2.000000e-06 : f32
    %31 = vector.broadcast %cst_19 : f32 to vector<8x1xf32>
    %32 = arith.mulf %31, %30 : vector<8x1xf32>
    %33 = arith.addf %28, %32 : vector<8x1xf32>
    %cst_20 = arith.constant 3.200000e-11 : f32
    %34 = vector.broadcast %cst_20 : f32 to vector<8x1xf32>
    %35 = arith.addf %33, %34 : vector<8x1xf32>
    %cst_21 = arith.constant 0.000000e+00 : f32
    %36 = vector.broadcast %cst_21 : f32 to vector<8x1xf32>
    %37 = arith.maximumf %35, %36 : vector<8x1xf32>
    %38 = math.sqrt %37 : vector<8x1xf32>
    %39 = arith.subf %24, %38 : vector<8x1xf32>
    %cst_22 = arith.constant 0.000000e+00 : f32
    %40 = vector.broadcast %cst_22 : f32 to vector<8x1xf32>
    %41 = arith.maximumf %39, %40 : vector<8x1xf32>
    %42 = arith.subf %3, %7 : vector<8x32xf32>
    %43 = arith.mulf %42, %42 : vector<8x32xf32>
    %cst_23 = arith.constant dense<0.000000e+00> : vector<8xf32>
    %44 = vector.multi_reduction <add>, %43, %cst_23 [1] : vector<8x32xf32> to vector<8xf32>
    %45 = vector.shape_cast %44 : vector<8xf32> to vector<8x1xf32>
    %cst_24 = arith.constant dense<0.000000e+00> : vector<8xf32>
    %46 = vector.multi_reduction <add>, %42, %cst_24 [1] : vector<8x32xf32> to vector<8xf32>
    %47 = vector.shape_cast %46 : vector<8xf32> to vector<8x1xf32>
    %cst_25 = arith.constant 2.000000e-06 : f32
    %48 = vector.broadcast %cst_25 : f32 to vector<8x1xf32>
    %49 = arith.mulf %48, %47 : vector<8x1xf32>
    %50 = arith.addf %45, %49 : vector<8x1xf32>
    %cst_26 = arith.constant 3.200000e-11 : f32
    %51 = vector.broadcast %cst_26 : f32 to vector<8x1xf32>
    %52 = arith.addf %50, %51 : vector<8x1xf32>
    %cst_27 = arith.constant 0.000000e+00 : f32
    %53 = vector.broadcast %cst_27 : f32 to vector<8x1xf32>
    %54 = arith.maximumf %52, %53 : vector<8x1xf32>
    %55 = math.sqrt %54 : vector<8x1xf32>
    %cst_28 = arith.constant 3.000000e-01 : f32
    %56 = vector.broadcast %cst_28 : f32 to vector<8x1xf32>
    %57 = arith.addf %56, %55 : vector<8x1xf32>
    %58 = arith.subf %3, %8 : vector<8x32xf32>
    %59 = arith.mulf %58, %58 : vector<8x32xf32>
    %cst_29 = arith.constant dense<0.000000e+00> : vector<8xf32>
    %60 = vector.multi_reduction <add>, %59, %cst_29 [1] : vector<8x32xf32> to vector<8xf32>
    %61 = vector.shape_cast %60 : vector<8xf32> to vector<8x1xf32>
    %cst_30 = arith.constant dense<0.000000e+00> : vector<8xf32>
    %62 = vector.multi_reduction <add>, %58, %cst_30 [1] : vector<8x32xf32> to vector<8xf32>
    %63 = vector.shape_cast %62 : vector<8xf32> to vector<8x1xf32>
    %cst_31 = arith.constant 2.000000e-06 : f32
    %64 = vector.broadcast %cst_31 : f32 to vector<8x1xf32>
    %65 = arith.mulf %64, %63 : vector<8x1xf32>
    %66 = arith.addf %61, %65 : vector<8x1xf32>
    %cst_32 = arith.constant 3.200000e-11 : f32
    %67 = vector.broadcast %cst_32 : f32 to vector<8x1xf32>
    %68 = arith.addf %66, %67 : vector<8x1xf32>
    %cst_33 = arith.constant 0.000000e+00 : f32
    %69 = vector.broadcast %cst_33 : f32 to vector<8x1xf32>
    %70 = arith.maximumf %68, %69 : vector<8x1xf32>
    %71 = math.sqrt %70 : vector<8x1xf32>
    %72 = arith.subf %57, %71 : vector<8x1xf32>
    %cst_34 = arith.constant 0.000000e+00 : f32
    %73 = vector.broadcast %cst_34 : f32 to vector<8x1xf32>
    %74 = arith.maximumf %72, %73 : vector<8x1xf32>
    %75 = arith.addf %41, %74 : vector<8x1xf32>
    %76 = arith.subf %6, %4 : vector<8x32xf32>
    %77 = arith.mulf %76, %76 : vector<8x32xf32>
    %cst_35 = arith.constant dense<0.000000e+00> : vector<8xf32>
    %78 = vector.multi_reduction <add>, %77, %cst_35 [1] : vector<8x32xf32> to vector<8xf32>
    %79 = vector.shape_cast %78 : vector<8xf32> to vector<8x1xf32>
    %cst_36 = arith.constant dense<0.000000e+00> : vector<8xf32>
    %80 = vector.multi_reduction <add>, %76, %cst_36 [1] : vector<8x32xf32> to vector<8xf32>
    %81 = vector.shape_cast %80 : vector<8xf32> to vector<8x1xf32>
    %cst_37 = arith.constant 2.000000e-06 : f32
    %82 = vector.broadcast %cst_37 : f32 to vector<8x1xf32>
    %83 = arith.mulf %82, %81 : vector<8x1xf32>
    %84 = arith.addf %79, %83 : vector<8x1xf32>
    %cst_38 = arith.constant 3.200000e-11 : f32
    %85 = vector.broadcast %cst_38 : f32 to vector<8x1xf32>
    %86 = arith.addf %84, %85 : vector<8x1xf32>
    %cst_39 = arith.constant 0.000000e+00 : f32
    %87 = vector.broadcast %cst_39 : f32 to vector<8x1xf32>
    %88 = arith.maximumf %86, %87 : vector<8x1xf32>
    %89 = math.sqrt %88 : vector<8x1xf32>
    %cst_40 = arith.constant 4.000000e-01 : f32
    %90 = vector.broadcast %cst_40 : f32 to vector<8x1xf32>
    %91 = arith.addf %90, %89 : vector<8x1xf32>
    %92 = arith.subf %6, %5 : vector<8x32xf32>
    %93 = arith.mulf %92, %92 : vector<8x32xf32>
    %cst_41 = arith.constant dense<0.000000e+00> : vector<8xf32>
    %94 = vector.multi_reduction <add>, %93, %cst_41 [1] : vector<8x32xf32> to vector<8xf32>
    %95 = vector.shape_cast %94 : vector<8xf32> to vector<8x1xf32>
    %cst_42 = arith.constant dense<0.000000e+00> : vector<8xf32>
    %96 = vector.multi_reduction <add>, %92, %cst_42 [1] : vector<8x32xf32> to vector<8xf32>
    %97 = vector.shape_cast %96 : vector<8xf32> to vector<8x1xf32>
    %cst_43 = arith.constant 2.000000e-06 : f32
    %98 = vector.broadcast %cst_43 : f32 to vector<8x1xf32>
    %99 = arith.mulf %98, %97 : vector<8x1xf32>
    %100 = arith.addf %95, %99 : vector<8x1xf32>
    %cst_44 = arith.constant 3.200000e-11 : f32
    %101 = vector.broadcast %cst_44 : f32 to vector<8x1xf32>
    %102 = arith.addf %100, %101 : vector<8x1xf32>
    %cst_45 = arith.constant 0.000000e+00 : f32
    %103 = vector.broadcast %cst_45 : f32 to vector<8x1xf32>
    %104 = arith.maximumf %102, %103 : vector<8x1xf32>
    %105 = math.sqrt %104 : vector<8x1xf32>
    %106 = arith.subf %91, %105 : vector<8x1xf32>
    %cst_46 = arith.constant 0.000000e+00 : f32
    %107 = vector.broadcast %cst_46 : f32 to vector<8x1xf32>
    %108 = arith.maximumf %106, %107 : vector<8x1xf32>
    %109 = arith.addf %75, %108 : vector<8x1xf32>
    %110 = arith.subf %6, %7 : vector<8x32xf32>
    %111 = arith.mulf %110, %110 : vector<8x32xf32>
    %cst_47 = arith.constant dense<0.000000e+00> : vector<8xf32>
    %112 = vector.multi_reduction <add>, %111, %cst_47 [1] : vector<8x32xf32> to vector<8xf32>
    %113 = vector.shape_cast %112 : vector<8xf32> to vector<8x1xf32>
    %cst_48 = arith.constant dense<0.000000e+00> : vector<8xf32>
    %114 = vector.multi_reduction <add>, %110, %cst_48 [1] : vector<8x32xf32> to vector<8xf32>
    %115 = vector.shape_cast %114 : vector<8xf32> to vector<8x1xf32>
    %cst_49 = arith.constant 2.000000e-06 : f32
    %116 = vector.broadcast %cst_49 : f32 to vector<8x1xf32>
    %117 = arith.mulf %116, %115 : vector<8x1xf32>
    %118 = arith.addf %113, %117 : vector<8x1xf32>
    %cst_50 = arith.constant 3.200000e-11 : f32
    %119 = vector.broadcast %cst_50 : f32 to vector<8x1xf32>
    %120 = arith.addf %118, %119 : vector<8x1xf32>
    %cst_51 = arith.constant 0.000000e+00 : f32
    %121 = vector.broadcast %cst_51 : f32 to vector<8x1xf32>
    %122 = arith.maximumf %120, %121 : vector<8x1xf32>
    %123 = math.sqrt %122 : vector<8x1xf32>
    %cst_52 = arith.constant 5.000000e-01 : f32
    %124 = vector.broadcast %cst_52 : f32 to vector<8x1xf32>
    %125 = arith.addf %124, %123 : vector<8x1xf32>
    %126 = arith.subf %6, %8 : vector<8x32xf32>
    %127 = arith.mulf %126, %126 : vector<8x32xf32>
    %cst_53 = arith.constant dense<0.000000e+00> : vector<8xf32>
    %128 = vector.multi_reduction <add>, %127, %cst_53 [1] : vector<8x32xf32> to vector<8xf32>
    %129 = vector.shape_cast %128 : vector<8xf32> to vector<8x1xf32>
    %cst_54 = arith.constant dense<0.000000e+00> : vector<8xf32>
    %130 = vector.multi_reduction <add>, %126, %cst_54 [1] : vector<8x32xf32> to vector<8xf32>
    %131 = vector.shape_cast %130 : vector<8xf32> to vector<8x1xf32>
    %cst_55 = arith.constant 2.000000e-06 : f32
    %132 = vector.broadcast %cst_55 : f32 to vector<8x1xf32>
    %133 = arith.mulf %132, %131 : vector<8x1xf32>
    %134 = arith.addf %129, %133 : vector<8x1xf32>
    %cst_56 = arith.constant 3.200000e-11 : f32
    %135 = vector.broadcast %cst_56 : f32 to vector<8x1xf32>
    %136 = arith.addf %134, %135 : vector<8x1xf32>
    %cst_57 = arith.constant 0.000000e+00 : f32
    %137 = vector.broadcast %cst_57 : f32 to vector<8x1xf32>
    %138 = arith.maximumf %136, %137 : vector<8x1xf32>
    %139 = math.sqrt %138 : vector<8x1xf32>
    %140 = arith.subf %125, %139 : vector<8x1xf32>
    %cst_58 = arith.constant 0.000000e+00 : f32
    %141 = vector.broadcast %cst_58 : f32 to vector<8x1xf32>
    %142 = arith.maximumf %140, %141 : vector<8x1xf32>
    %143 = arith.addf %109, %142 : vector<8x1xf32>
    %c1_i32 = arith.constant 1 : i32
    %144 = arith.muli %arg0, %c1_i32 : i32
    %145 = arith.addi %144, %arg1 : i32
    %c8_i32 = arith.constant 8 : i32
    %146 = arith.muli %145, %c8_i32 : i32
    %147 = tpu.iota {dimensions = array<i32: 0>} : vector<8x1xi32>
    %148 = vector.broadcast %146 : i32 to vector<8x1xi32>
    %149 = arith.addi %148, %147 : vector<8x1xi32>
    %c8_i32_59 = arith.constant 8 : i32
    %150 = vector.broadcast %c8_i32_59 : i32 to vector<8x1xi32>
    %151 = arith.cmpi slt, %149, %150 : vector<8x1xi32>
    %cst_60 = arith.constant 0.000000e+00 : f32
    %152 = vector.broadcast %cst_60 : f32 to vector<8x1xf32>
    %153 = arith.select %151, %143, %152 : vector<8x1xi1>, vector<8x1xf32>
    %c0_61 = arith.constant 0 : index
    %c0_62 = arith.constant 0 : index
    %c0_63 = arith.constant 0 : index
    %154 = vector.load %arg8[%c0_61, %c0_62, %c0_63] : memref<1x8x128xf32, #tpu.memory_space<vmem>>, vector<1x8x128xf32>
    %155 = vector.shape_cast %153 : vector<8x1xf32> to vector<1x8x1xf32>
    %cst_64 = arith.constant dense<0.000000e+00> : vector<1xf32>
    %156 = vector.multi_reduction <add>, %155, %cst_64 [1, 2] : vector<1x8x1xf32> to vector<1xf32>
    %157 = vector.shape_cast %156 : vector<1xf32> to vector<1x1x1xf32>
    %158 = vector.extract %157[0, 0, 0] : f32 from vector<1x1x1xf32>
    %159 = vector.broadcast %158 : f32 to vector<1x8x128xf32>
    %160 = arith.addf %154, %159 : vector<1x8x128xf32>
    %c0_65 = arith.constant 0 : index
    %c0_66 = arith.constant 0 : index
    %c0_67 = arith.constant 0 : index
    %161 = vector.load %arg8[%c0_65, %c0_66, %c0_67] : memref<1x8x128xf32, #tpu.memory_space<vmem>>, vector<1x8x128xf32>
    tpu.vector_store %arg8[%c0_65, %c0_66, %c0_67], %160 {strides = array<i32>} : memref<1x8x128xf32, #tpu.memory_space<vmem>>, vector<1x8x128xf32>,
    %c0_i32_68 = arith.constant 0 : i32
    %162 = arith.cmpi eq, %arg1, %c0_i32_68 : i32
    %163 = arith.extui %162 : i1 to i32
    %c0_i32_69 = arith.constant 0 : i32
    %164 = arith.cmpi ne, %163, %c0_i32_69 : i32
    scf.if %164 {
      %c0_70 = arith.constant 0 : index
      %c0_71 = arith.constant 0 : index
      %c0_72 = arith.constant 0 : index
      %165 = vector.load %arg8[%c0_70, %c0_71, %c0_72] : memref<1x8x128xf32, #tpu.memory_space<vmem>>, vector<1x8x128xf32>
      %cst_73 = arith.constant 1.250000e-01 : f32
      %166 = vector.broadcast %cst_73 : f32 to vector<1x8x128xf32>
      %167 = arith.mulf %165, %166 : vector<1x8x128xf32>
      %c0_74 = arith.constant 0 : index
      %c0_75 = arith.constant 0 : index
      %c0_76 = arith.constant 0 : index
      %168 = vector.load %arg8[%c0_74, %c0_75, %c0_76] : memref<1x8x128xf32, #tpu.memory_space<vmem>>, vector<1x8x128xf32>
      tpu.vector_store %arg8[%c0_74, %c0_75, %c0_76], %167 {strides = array<i32>} : memref<1x8x128xf32, #tpu.memory_space<vmem>>, vector<1x8x128xf32>,
    } else {
    }
    return
  }
  func.func @transform_0(%arg0: i32, %arg1: i32) -> (i32, i32) {
    %c1_i32 = arith.constant 1 : i32
    %0 = arith.muli %arg0, %c1_i32 : i32
    %1 = arith.addi %0, %arg1 : i32
    %c0_i32 = arith.constant 0 : i32
    %2 = arith.minsi %1, %c0_i32 : i32
    %c0_i32_0 = arith.constant 0 : i32
    %c0_i32_1 = arith.constant 0 : i32
    return %2, %c0_i32_0 : i32, i32
  }
  func.func @transform_1(%arg0: i32, %arg1: i32) -> (i32, i32) {
    %c1_i32 = arith.constant 1 : i32
    %0 = arith.muli %arg0, %c1_i32 : i32
    %1 = arith.addi %0, %arg1 : i32
    %c0_i32 = arith.constant 0 : i32
    %2 = arith.minsi %1, %c0_i32 : i32
    %c0_i32_0 = arith.constant 0 : i32
    %c0_i32_1 = arith.constant 0 : i32
    return %2, %c0_i32_0 : i32, i32
  }
  func.func @transform_2(%arg0: i32, %arg1: i32) -> (i32, i32) {
    %c1_i32 = arith.constant 1 : i32
    %0 = arith.muli %arg0, %c1_i32 : i32
    %1 = arith.addi %0, %arg1 : i32
    %c0_i32 = arith.constant 0 : i32
    %2 = arith.minsi %1, %c0_i32 : i32
    %c0_i32_0 = arith.constant 0 : i32
    %c0_i32_1 = arith.constant 0 : i32
    return %2, %c0_i32_0 : i32, i32
  }
  func.func @transform_3(%arg0: i32, %arg1: i32) -> (i32, i32) {
    %c1_i32 = arith.constant 1 : i32
    %0 = arith.muli %arg0, %c1_i32 : i32
    %1 = arith.addi %0, %arg1 : i32
    %c0_i32 = arith.constant 0 : i32
    %2 = arith.minsi %1, %c0_i32 : i32
    %c0_i32_0 = arith.constant 0 : i32
    %c0_i32_1 = arith.constant 0 : i32
    return %2, %c0_i32_0 : i32, i32
  }
  func.func @transform_4(%arg0: i32, %arg1: i32) -> (i32, i32) {
    %c1_i32 = arith.constant 1 : i32
    %0 = arith.muli %arg0, %c1_i32 : i32
    %1 = arith.addi %0, %arg1 : i32
    %c0_i32 = arith.constant 0 : i32
    %2 = arith.minsi %1, %c0_i32 : i32
    %c0_i32_0 = arith.constant 0 : i32
    %c0_i32_1 = arith.constant 0 : i32
    return %2, %c0_i32_0 : i32, i32
  }
  func.func @transform_5(%arg0: i32, %arg1: i32) -> (i32, i32) {
    %c1_i32 = arith.constant 1 : i32
    %0 = arith.muli %arg0, %c1_i32 : i32
    %1 = arith.addi %0, %arg1 : i32
    %c0_i32 = arith.constant 0 : i32
    %2 = arith.minsi %1, %c0_i32 : i32
    %c0_i32_0 = arith.constant 0 : i32
    %c0_i32_1 = arith.constant 0 : i32
    return %2, %c0_i32_0 : i32, i32
  }
  func.func @transform_6(%arg0: i32, %arg1: i32) -> (i32, i32, i32) {
    %c0_i32 = arith.constant 0 : i32
    %c0_i32_0 = arith.constant 0 : i32
    %c0_i32_1 = arith.constant 0 : i32
    return %arg0, %c0_i32, %c0_i32_0 : i32, i32, i32
  }
}

</mosaic_0001>

<bundles_post_ra>
// kernel: tpu_custom_call.1
= control target key start
LH: loop header
LB: loop body
LE: loop exit
PB: predicated region body
PF: predicated region fallthrough
CT: control target
= control target key end

     0   :  { %11 = vsyncpa [#allocation3], 0  ;;  %s797_s0 = inlined_call_operand.hbm [shape: f32[8,32], index: 0, kind: input, shape index: {}]   ;;  %s798_s1 = inlined_call_operand.hbm [shape: f32[8,32], index: 1, kind: input, shape index: {}]   ;;  %s799_s2 = inlined_call_operand.hbm [shape: f32[8,32], index: 2, kind: input, shape index: {}]   ;;  %s800_s3 = inlined_call_operand.hbm [shape: f32[8,32], index: 3, kind: input, shape index: {}]   ;;  %s801_s4 = inlined_call_operand.hbm [shape: f32[8,32], index: 4, kind: input, shape index: {}]   ;;  %s802_s5 = inlined_call_operand.hbm [shape: f32[8,32], index: 5, kind: input, shape index: {}]   ;;  %s803_s6 = inlined_call_operand.hbm [shape: f32[1,8,128], index: 6, kind: output, shape index: {}]  }
   0x1   :  { %12 = vsyncpa [#allocation6], 0 }
   0x2   :  { %13 = vsyncpa [#allocation9], 0 }
   0x3   :  { %14 = vsyncpa [#allocation12], 0  ;;  %s42_s23 = sshll.u32 %s798_s1, 4  ;;  %s43_s23 = int_to_ptr.hbm [resolvable:$true] %s42_s23 }
   0x4   :  { %15 = vsyncpa [#allocation4], 0  ;;  %s638_s24 = smov [#allocation5]   ;;  %s74_s28 = sshll.u32 %s800_s3, 4  ;;  %s75_s28 = int_to_ptr.hbm [resolvable:$true] %s74_s28 }
   0x5   :  { %s44_s25 = sshll.u32 %s638_s24, 4  ;;  %s639_s29 = smov [#allocation8]   ;;  %s45_s25 = int_to_ptr.vmem [resolvable:$true] %s44_s25 }
   0x6   :  { %47 = dma.hbm_to_vmem [thread:$0]  %s43_s23, 128, %s45_s25, [#allocation6]  }
   0x7   :  { %s76_s30 = sshll.u32 %s639_s29, 4  ;;  %s26_s9 = sshll.u32 %s797_s0, 4  ;;  %s77_s30 = int_to_ptr.vmem [resolvable:$true] %s76_s30  ;;  %s27_s9 = int_to_ptr.hbm [resolvable:$true] %s26_s9 }
   0x8   :  { %79 = dma.hbm_to_vmem [thread:$0]  %s75_s28, 128, %s77_s30, [#allocation9]  }
   0x9   :  { %s58_s11 = sshll.u32 %s799_s2, 4  ;;  %s640_s12 = smov [#allocation2]   ;;  %s59_s11 = int_to_ptr.hbm [resolvable:$true] %s58_s11 }
   0xa   :  { %s28_s13 = sshll.u32 %s640_s12, 4  ;;  %s641_s3 = smov [#allocation7]   ;;  %s29_s13 = int_to_ptr.vmem [resolvable:$true] %s28_s13 }
   0xb   :  { %31 = dma.hbm_to_vmem [thread:$0]  %s27_s9, 128, %s29_s13, [#allocation3]  }
   0xc   :  { %s60_s14 = sshll.u32 %s641_s3, 4  ;;  %s90_s17 = sshll.u32 %s801_s4, 4  ;;  %s61_s14 = int_to_ptr.vmem [resolvable:$true] %s60_s14  ;;  %s91_s17 = int_to_ptr.hbm [resolvable:$true] %s90_s17 }
   0xd   :  { %63 = dma.hbm_to_vmem [thread:$0]  %s59_s11, 128, %s61_s14, [#allocation6]  }
   0xe   :  { %s106_s19 = sshll.u32 %s802_s5, 4  ;;  %s642_s20 = smov [#allocation10]   ;;  %s107_s19 = int_to_ptr.hbm [resolvable:$true] %s106_s19 }
   0xf   :  { %s92_s2 = sshll.u32 %s642_s20, 4  ;;  %s643_s21 = smov [#allocation11]   ;;  %s93_s2 = int_to_ptr.vmem [resolvable:$true] %s92_s2 }
  0x10   :  { %95 = dma.hbm_to_vmem [thread:$0]  %s91_s17, 128, %s93_s2, [#allocation9]  }
  0x11   :  { %s108_s22 = sshll.u32 %s643_s21, 4  ;;  %s109_s22 = int_to_ptr.vmem [resolvable:$true] %s108_s22 }
  0x12   :  { %111 = dma.hbm_to_vmem [thread:$0]  %s107_s19, 128, %s109_s22, [#allocation12]  }
  0x13   :  { %628 = dma.done.wait [#allocation3], 128  }
  0x14   :  { %629 = vsyncadd [#allocation3], 4294967168 }
  0x15   :  { %630 = dma.done.wait [#allocation6], 256  }
  0x16   :  { %631 = vsyncadd [#allocation6], 4294967040 }
  0x17   :  { %632 = dma.done.wait [#allocation9], 256  }
  0x18   :  { %633 = vsyncadd [#allocation9], 4294967040 }
  0x19   :  { %634 = dma.done.wait [#allocation12], 128  }
  0x1a   :  { %635 = vsyncadd [#allocation12], 4294967168  ;;  %v159_v0 = vld [vmem:[#allocation2] sm:$0xff]  ;;  %v164_v1 = vld [vmem:[#allocation11] sm:$0xff]  ;;  %vm167_vm0 = vcmask 261120   ;;  %s644_s5 = smov [#allocation13]  }
  0x1b   :  { %v161_v2 = vld [vmem:[#allocation7] sm:$0xff]  ;;  %v242_v3 = vsub.f32 %v159_v0, %v164_v1  ;;  %v160_v5 = vld [vmem:[#allocation5] sm:$0xff]  ;;  %v163_v6 = vld [vmem:[#allocation10] sm:$0xff]  ;;  %s407_s23 = sshll.u32 %s644_s5, 4  ;;  %s409_s26 = sshll.u32 %s803_s6, 4  ;;  %s408_s23 = int_to_ptr.vmem [resolvable:$true] %s407_s23  ;;  %s410_s26 = int_to_ptr.hbm [resolvable:$true] %s409_s26 }
  0x1c   :  { %v191_v4 = vsub.f32 %v159_v0, %v161_v2  ;;  %v165_v7 = vsub.f32 %v159_v0, %v160_v5  ;;  %v217_v8 = vsub.f32 %v159_v0, %v163_v6  ;;  %v162_v17 = vld [vmem:[#allocation8] sm:$0xff] }
  0x1d   :  { %v247_v9 = vsel %vm167_vm0, %v242_v3, 0.0  ;;  %v243_v18 = vmul.f32 %v242_v3, %v242_v3  ;;  %v269_v20 = vsub.f32 %v162_v17, %v160_v5  ;;  %v294_v24 = vsub.f32 %v162_v17, %v161_v2 }
  0x1e   :  { %v196_v10 = vsel %vm167_vm0, %v191_v4, 0.0  ;;  %248 = vadd.xlane.f32.xlu2 %v247_v9  ;;  %v171_v11 = vsel %vm167_vm0, %v165_v7, 0.0  ;;  %v218_v12 = vmul.f32 %v217_v8, %v217_v8  ;;  %v166_v13 = vmul.f32 %v165_v7, %v165_v7 }
  0x1f   :  { %197 = vadd.xlane.f32.xlu1 %v196_v10  ;;  %172 = vadd.xlane.f32.xlu0 %v171_v11  ;;  %v222_v16 = vsel %vm167_vm0, %v217_v8, 0.0  ;;  %v192_v19 = vmul.f32 %v191_v4, %v191_v4  ;;  %v244_v21 = vsel %vm167_vm0, %v243_v18, 0.0  ;;  %v274_v23 = vsel %vm167_vm0, %v269_v20, 0.0 }
  0x20   :  { %v219_v14 = vsel %vm167_vm0, %v218_v12, 0.0  ;;  %v168_v15 = vsel %vm167_vm0, %v166_v13, 0.0  ;;  %v321_v25 = vsub.f32 %v162_v17, %v163_v6  ;;  %v270_v26 = vmul.f32 %v269_v20, %v269_v20 }
  0x21   :  { %v193_v22 = vsel %vm167_vm0, %v192_v19, 0.0  ;;  %v299_v27 = vsel %vm167_vm0, %v294_v24, 0.0  ;;  %v346_v31 = vsub.f32 %v162_v17, %v164_v1  ;;  %v295_v32 = vmul.f32 %v294_v24, %v294_v24 }
  0x22   :  { %v326_v28 = vsel %vm167_vm0, %v321_v25, 0.0  ;;  %v271_v29 = vsel %vm167_vm0, %v270_v26, 0.0  ;;  %v322_v30 = vmul.f32 %v321_v25, %v321_v25 }
  0x23   :  { %v351_v34 = vsel %vm167_vm0, %v346_v31, 0.0  ;;  %v296_v35 = vsel %vm167_vm0, %v295_v32, 0.0  ;;  %v347_v36 = vmul.f32 %v346_v31, %v346_v31 }
  0x24   :  { %v323_v33 = vsel %vm167_vm0, %v322_v30, 0.0 }
  0x25   :  { %v348_v37 = vsel %vm167_vm0, %v347_v36, 0.0 }
  0x26   :  { %220 = vadd.xlane.f32.xlu2 %v219_v14 }
  0x27   :  { %169 = vadd.xlane.f32.xlu1 %v168_v15  ;;  %223 = vadd.xlane.f32.xlu0 %v222_v16 }
  0x2e   :  { %245 = vadd.xlane.f32.xlu2 %v244_v21 }
  0x2f   :  { %194 = vadd.xlane.f32.xlu1 %v193_v22  ;;  %275 = vadd.xlane.f32.xlu0 %v274_v23 }
  0x36   :  { %327 = vadd.xlane.f32.xlu2 %v326_v28 }
  0x37   :  { %300 = vadd.xlane.f32.xlu1 %v299_v27  ;;  %272 = vadd.xlane.f32.xlu0 %v271_v29 }
  0x3e   :  { %352 = vadd.xlane.f32.xlu2 %v351_v34 }
  0x3f   :  { %324 = vadd.xlane.f32.xlu1 %v323_v33  ;;  %297 = vadd.xlane.f32.xlu0 %v296_v35 }
  0x47   :  { %349 = vadd.xlane.f32.xlu0 %v348_v37 }
  0x91   :  { %v249_v38 = vpop.xlane.xlu2 %248 }
  0x92   :  { %v198_v39 = vpop.xlane.xlu1 %197  ;;  %v173_v40 = vpop.xlane.xlu0 %172  ;;  %v250_v50 = vmul.f32 2e-06, %v249_v38 }
  0x93   :  { %v174_v41 = vmul.f32 2e-06, %v173_v40  ;;  %v199_v51 = vmul.f32 2e-06, %v198_v39 }
  0x99   :  { %v221_v42 = vpop.xlane.xlu2 %220 }
  0x9a   :  { %v170_v43 = vpop.xlane.xlu1 %169  ;;  %v224_v44 = vpop.xlane.xlu0 %223 }
  0x9b   :  { %v175_v45 = vadd.f32 %v174_v41, %v170_v43  ;;  %v225_v46 = vmul.f32 2e-06, %v224_v44 }
  0x9d   :  { %v226_v47 = vadd.f32 %v225_v46, %v221_v42  ;;  %v176_v48 = vadd.f32 3.2e-11, %v175_v45 }
  0x9f   :  { %v227_v49 = vadd.f32 3.2e-11, %v226_v47  ;;  %v716_v53 = vmax.f32 %v176_v48, 0.0 }
  0xa1   :  { %v714_v52 = vmax.f32 %v227_v49, 0.0  ;;  %v246_v54 = vpop.xlane.xlu2 %245  ;;  %vm185_vm1 = vcmp.eq.f32.partialorder %v716_v53, inf  ;;  %vm187_vm2 = vcmp.eq.f32.partialorder %v716_v53, 0.0 }
  0xa2   :  { %v195_v55 = vpop.xlane.xlu1 %194  ;;  %v251_v56 = vadd.f32 %v250_v50, %v246_v54  ;;  %v276_v57 = vpop.xlane.xlu0 %275 }
  0xa3   :  { %v200_v58 = vadd.f32 %v199_v51, %v195_v55  ;;  %444 = vrsqrt.f32 %v714_v52  ;;  %v277_v0 = vmul.f32 2e-06, %v276_v57  ;;  %vm236_vm3 = vcmp.eq.f32.partialorder %v714_v52, inf }
  0xa4   :  { %v252_v59 = vadd.f32 3.2e-11, %v251_v56  ;;  %446 = vrsqrt.f32 %v716_v53  ;;  %vm238_vm4 = vcmp.eq.f32.partialorder %v714_v52, 0.0 }
  0xa5   :  { %v201_v60 = vadd.f32 3.2e-11, %v200_v58 }
  0xa6   :  { %v720_v61 = vmax.f32 %v252_v59, 0.0  ;;  %v188_v59 = vand.u32 2147483648, %v716_v53 }
  0xa7   :  { %v722_v62 = vmax.f32 %v201_v60, 0.0 }
  0xa8   :  { %448 = vrsqrt.f32 %v720_v61  ;;  %vm261_vm7 = vcmp.eq.f32.partialorder %v720_v61, inf  ;;  %vm263_vm8 = vcmp.eq.f32.partialorder %v720_v61, 0.0 }
  0xa9   :  { %v445_v63 = vpop.eup %444  ;;  %450 = vrsqrt.f32 %v722_v62  ;;  %v328_v3 = vpop.xlane.xlu2 %327  ;;  %vm210_vm5 = vcmp.eq.f32.partialorder %v722_v62, inf  ;;  %vm212_vm6 = vcmp.eq.f32.partialorder %v722_v62, 0.0 }
  0xaa   :  { %v301_v1 = vpop.xlane.xlu1 %300  ;;  %v273_v2 = vpop.xlane.xlu0 %272  ;;  %v230_v6 = vmul.f32 %v445_v63, %v714_v52  ;;  %v329_v9 = vmul.f32 2e-06, %v328_v3 }
  0xab   :  { %v447_v4 = vpop.eup %446  ;;  %v278_v5 = vadd.f32 %v277_v0, %v273_v2  ;;  %v302_v13 = vmul.f32 2e-06, %v301_v1  ;;  %v239_v2 = vand.u32 2147483648, %v714_v52 }
  0xac   :  { %v179_v10 = vmul.f32 %v447_v4, %v716_v53  ;;  %v231_v14 = vmul.f32 %v445_v63, %v230_v6 }
  0xad   :  { %v279_v7 = vadd.f32 3.2e-11, %v278_v5 }
  0xae   :  { %v449_v8 = vpop.eup %448  ;;  %v180_v20 = vmul.f32 %v447_v4, %v179_v10  ;;  %v232_v22 = vmul.f32 0.5, %v231_v14 }
  0xaf   :  { %v451_v11 = vpop.eup %450  ;;  %v728_v12 = vmax.f32 %v279_v7, 0.0  ;;  %v255_v15 = vmul.f32 %v449_v8, %v720_v61 }
  0xb0   :  { %v204_v16 = vmul.f32 %v451_v11, %v722_v62  ;;  %v181_v29 = vmul.f32 0.5, %v180_v20  ;;  %v233_v33 = vsub.f32 1.5, %v232_v22 }
  0xb1   :  { %452 = vrsqrt.f32 %v728_v12  ;;  %v256_v23 = vmul.f32 %v449_v8, %v255_v15  ;;  %v353_v25 = vpop.xlane.xlu2 %352  ;;  %v264_v15 = vand.u32 2147483648, %v720_v61  ;;  %vm288_vm9 = vcmp.eq.f32.partialorder %v728_v12, inf }
  0xb2   :  { %v325_v17 = vpop.xlane.xlu1 %324  ;;  %v298_v18 = vpop.xlane.xlu0 %297  ;;  %v205_v26 = vmul.f32 %v451_v11, %v204_v16  ;;  %v354_v32 = vmul.f32 2e-06, %v353_v25  ;;  %v182_v38 = vsub.f32 1.5, %v181_v29  ;;  %v234_v41 = vmul.f32 %v445_v63, %v233_v33 }
  0xb3   :  { %v330_v19 = vadd.f32 %v329_v9, %v325_v17  ;;  %v303_v21 = vadd.f32 %v302_v13, %v298_v18  ;;  %v257_v34 = vmul.f32 0.5, %v256_v23  ;;  %vm290_vm10 = vcmp.eq.f32.partialorder %v728_v12, 0.0 }
  0xb4   :  { %v206_v35 = vmul.f32 0.5, %v205_v26  ;;  %v183_v47 = vmul.f32 %v447_v4, %v182_v38  ;;  %v235_v51 = vmul.f32 %v234_v41, %v714_v52 }
  0xb5   :  { %v331_v24 = vadd.f32 3.2e-11, %v330_v19  ;;  %v304_v27 = vadd.f32 3.2e-11, %v303_v21  ;;  %v258_v42 = vsub.f32 1.5, %v257_v34 }
  0xb6   :  { %v207_v43 = vsub.f32 1.5, %v206_v35  ;;  %v184_v63 = vmul.f32 %v183_v47, %v716_v53  ;;  %v237_v1 = vsel %vm236_vm3, %v714_v52, %v235_v51 }
  0xb7   :  { %v733_v28 = vmax.f32 %v331_v24, 0.0  ;;  %v453_v30 = vpop.eup %452  ;;  %v735_v31 = vmax.f32 %v304_v27, 0.0  ;;  %v259_v54 = vmul.f32 %v449_v8, %v258_v42  ;;  %v213_v8 = vand.u32 2147483648, %v722_v62 }
  0xb8   :  { %v282_v36 = vmul.f32 %v453_v30, %v728_v12  ;;  %v208_v56 = vmul.f32 %v451_v11, %v207_v43  ;;  %v186_v52 = vsel %vm185_vm1, %v716_v53, %v184_v63  ;;  %v240_v10 = vsel %vm238_vm4, %v239_v2, %v237_v1 }
  0xb9   :  { %454 = vrsqrt.f32 %v733_v28  ;;  %v260_v3 = vmul.f32 %v259_v54, %v720_v61  ;;  %v189_v21 = vsel %vm187_vm2, %v188_v59, %v186_v52  ;;  %v241_v22 = vadd.f32 0.3, %v240_v10 }
  0xba   :  { %456 = vrsqrt.f32 %v735_v31  ;;  %v350_v37 = vpop.xlane.xlu0 %349  ;;  %v283_v39 = vmul.f32 %v453_v30, %v282_v36  ;;  %v209_v5 = vmul.f32 %v208_v56, %v722_v62  ;;  %vm313_vm11 = vcmp.eq.f32.partialorder %v735_v31, inf }
  0xbb   :  { %v355_v40 = vadd.f32 %v354_v32, %v350_v37  ;;  %v262_v14 = vsel %vm261_vm7, %v720_v61, %v260_v3  ;;  %v291_v61 = vand.u32 2147483648, %v728_v12  ;;  %v316_v53 = vand.u32 2147483648, %v735_v31 }
  0xbc   :  { %v284_v44 = vmul.f32 0.5, %v283_v39  ;;  %v211_v17 = vsel %vm210_vm5, %v722_v62, %v209_v5  ;;  %v265_v23 = vsel %vm263_vm8, %v264_v15, %v262_v14  ;;  %vm315_vm12 = vcmp.eq.f32.partialorder %v735_v31, 0.0 }
  0xbd   :  { %v356_v45 = vadd.f32 3.2e-11, %v355_v40  ;;  %v214_v27 = vsel %vm212_vm6, %v213_v8, %v211_v17  ;;  %v266_v33 = vsub.f32 %v241_v22, %v265_v23  ;;  %vm340_vm13 = vcmp.eq.f32.partialorder %v733_v28, inf }
  0xbe   :  { %v285_v48 = vsub.f32 1.5, %v284_v44  ;;  %v343_v38 = vand.u32 2147483648, %v733_v28  ;;  %vm342_vm14 = vcmp.eq.f32.partialorder %v733_v28, 0.0  ;;  %vm382_vm1 = vcmask 7168  }
  0xbf   :  { %v455_v46 = vpop.eup %454  ;;  %v740_v50 = vmax.f32 %v356_v45, 0.0  ;;  %v267_v43 = vmax.f32 %v266_v33, 0.0 }
  0xc0   :  { %v457_v49 = vpop.eup %456  ;;  %v334_v55 = vmul.f32 %v455_v46, %v733_v28  ;;  %v286_v57 = vmul.f32 %v453_v30, %v285_v48  ;;  %v190_v30 = vadd.f32 0.2, %v189_v21 }
  0xc1   :  { %v307_v58 = vmul.f32 %v457_v49, %v735_v31  ;;  %458 = vrsqrt.f32 %v740_v50  ;;  %vm365_vm15 = vcmp.eq.f32.partialorder %v740_v50, inf  ;;  %v368_v44 = vand.u32 2147483648, %v740_v50 }
  0xc2   :  { %v335_v60 = vmul.f32 %v455_v46, %v334_v55  ;;  %v287_v6 = vmul.f32 %v286_v57, %v728_v12  ;;  %v215_v35 = vsub.f32 %v190_v30, %v214_v27  ;;  %vm367_vm0 = vcmp.eq.f32.partialorder %v740_v50, 0.0 }
  0xc3   :  { %v308_v0 = vmul.f32 %v457_v49, %v307_v58 }
  0xc4   :  { %v336_v4 = vmul.f32 0.5, %v335_v60  ;;  %v289_v18 = vsel %vm288_vm9, %v728_v12, %v287_v6  ;;  %v216_v42 = vmax.f32 %v215_v35, 0.0 }
  0xc5   :  { %v309_v7 = vmul.f32 0.5, %v308_v0  ;;  %v292_v29 = vsel %vm290_vm10, %v291_v61, %v289_v18 }
  0xc6   :  { %v337_v9 = vsub.f32 1.5, %v336_v4  ;;  %v293_v36 = vadd.f32 0.4, %v292_v29 }
  0xc7   :  { %v310_v11 = vsub.f32 1.5, %v309_v7  ;;  %v459_v13 = vpop.eup %458 }
  0xc8   :  { %v338_v16 = vmul.f32 %v455_v46, %v337_v9  ;;  %v359_v20 = vmul.f32 %v459_v13, %v740_v50 }
  0xc9   :  { %v311_v19 = vmul.f32 %v457_v49, %v310_v11  ;;  %v268_v49 = vadd.f32 %v267_v43, %v216_v42 }
  0xca   :  { %v339_v25 = vmul.f32 %v338_v16, %v733_v28  ;;  %v360_v26 = vmul.f32 %v459_v13, %v359_v20 }
  0xcb   :  { %v312_v24 = vmul.f32 %v311_v19, %v735_v31 }
  0xcc   :  { %v361_v12 = vmul.f32 0.5, %v360_v26  ;;  %v341_v62 = vsel %vm340_vm13, %v733_v28, %v339_v25 }
  0xcd   :  { %v314_v32 = vsel %vm313_vm11, %v735_v31, %v312_v24  ;;  %v344_v41 = vsel %vm342_vm14, %v343_v38, %v341_v62 }
  0xce   :  { %v317_v34 = vsel %vm315_vm12, %v316_v53, %v314_v32  ;;  %v362_v37 = vsub.f32 1.5, %v361_v12  ;;  %v345_v46 = vadd.f32 0.5, %v344_v41 }
  0xcf   :  { %v318_v39 = vsub.f32 %v293_v36, %v317_v34 }
  0xd0   :  { %v363_v40 = vmul.f32 %v459_v13, %v362_v37 }
  0xd1   :  { %v319_v45 = vmax.f32 %v318_v39, 0.0 }
  0xd2   :  { %v364_v31 = vmul.f32 %v363_v40, %v740_v50 }
  0xd3   :  { %v320_v28 = vadd.f32 %v319_v45, %v268_v49 }
  0xd4   :  { %v366_v47 = vsel %vm365_vm15, %v740_v50, %v364_v31 }
  0xd5   :  { %v369_v48 = vsel %vm367_vm0, %v368_v44, %v366_v47 }
  0xd6   :  { %v370_v51 = vsub.f32 %v345_v46, %v369_v48 }
  0xd8   :  { %v371_v54 = vmax.f32 %v370_v51, 0.0 }
  0xda   :  { %v372_v55 = vadd.f32 %v371_v54, %v320_v28 }
  0xdc   :  { %v383_v56 = vsel %vm382_vm1, %v372_v55, 0.0 }
  0xdd   :  { %384 = vadd.xlane.f32.xlu1 %v383_v56 }
 0x150   :  { %v385_v57 = vpop.xlane.xlu1 %384 }
 0x151   :  { %v386_v58 = vrot.slane %v385_v57, 4 }
 0x153   :  { %v387_v59 = vadd.f32 %v386_v58, %v385_v57 }
 0x155   :  { %v388_v60 = vrot.slane %v387_v59, 2 }
 0x157   :  { %v389_v63 = vadd.f32 %v388_v60, %v387_v59 }
 0x159   :  { %v390_v0 = vrot.slane %v389_v63, 1 }
 0x15b   :  { %v391_v1 = vadd.f32 %v390_v0, %v389_v63 }
 0x15d   :  { %434 = vpush %v391_v1 }
 0x18e   :  { %s435_s4 = spop %434 }
 0x18f   :  { %v393_v2 = vstv %s435_s4 }
 0x190   :  { %v400_v50 = vmul.f32 0.125, %v393_v2 }
 0x192   :  { %401 = vst [vmem:[#allocation13] sm:$0xff] %v400_v50 }
 0x193   :  { %412 = dma.vmem_to_hbm [thread:$0]  %s408_s23, 128, %s410_s26, [#allocation4]  }
 0x194   :  { %636 = dma.done.wait [#allocation4], 128  }
 0x195   :  { %637 = vsyncadd [#allocation4], 4294967168 }
 0x196   :  { %417 = vsyncpa [#allocation3], 1 }
 0x197   :  { %418 = vsyncpa [#allocation6], 1 }
 0x198   :  { %419 = vsyncpa [#allocation9], 1 }
 0x199   :  { %420 = vsyncpa [#allocation12], 1 }
 0x19a   :  { %421 = vsyncpa [#allocation4], 1 }

</bundles_post_ra>
